<compile_context>
chip_gen: v5e
topology: v5e:2x2
jax: 0.10.0
libtpu: 0.0.40
codegen_flags: <defaults>
</compile_context>

<pallas_src>
import functools
import math

import jax
import jax.numpy as jnp
from jax.experimental import pallas as pl
from jax.experimental.pallas import tpu as pltpu

_LANE = 128       # lane (last-dim) padding; use 256 for big hidden on v6e/v7x
_SUBLANE = 16     # sublane padding for bf16 activations


def _round_up(n, m):
    return ((n + m - 1) // m) * m


def _pad_to(a, shape):
    return jnp.pad(a, [(0, s - d) for d, s in zip(a.shape, shape)])


# ---------------------------------------------------------------------------
# Fused Pallas kernels: whole MLP in one call, activation register-resident.
# ---------------------------------------------------------------------------
def _mlp_kernel_hidden(x_ref, w0_ref, b0_ref, wh_ref, bh_ref, wo_ref, bo_ref,
                       o_ref, *, num_layers: int):
    # First layer + ReLU (bf16 dot inputs, f32 accumulation, f32 epilogue).
    h = jnp.dot(x_ref[...], w0_ref[...], preferred_element_type=jnp.float32)
    h = jnp.maximum(h + b0_ref[...], 0.0)

    # Hidden layers + ReLU.  Stacked weights (L, H, H) indexed statically;
    # fully unrolled, everything stays in vregs/VMEM.
    for l in range(num_layers):
        h = jnp.dot(h.astype(jnp.bfloat16), wh_ref[l],
                    preferred_element_type=jnp.float32)
        h = jnp.maximum(h + bh_ref[l], 0.0)

    # The reference applies f one extra time; ReLU is idempotent -> folded.

    # Output layer (no activation).
    o = jnp.dot(h.astype(jnp.bfloat16), wo_ref[...],
                preferred_element_type=jnp.float32)
    o_ref[...] = (o + bo_ref[...]).astype(o_ref.dtype)


def _mlp_kernel_no_hidden(x_ref, w0_ref, b0_ref, wo_ref, bo_ref, o_ref):
    h = jnp.dot(x_ref[...], w0_ref[...], preferred_element_type=jnp.float32)
    h = jnp.maximum(h + b0_ref[...], 0.0)
    o = jnp.dot(h.astype(jnp.bfloat16), wo_ref[...],
                preferred_element_type=jnp.float32)
    o_ref[...] = (o + bo_ref[...]).astype(o_ref.dtype)


# ---------------------------------------------------------------------------
# Parameter init (PyTorch nn.Linear-style uniform(-k, k), weight = (out, in)).
# ---------------------------------------------------------------------------
def init_linear(key, in_features, out_features):
    k = 1.0 / math.sqrt(in_features)
    kw, kb = jax.random.split(key)
    w = jax.random.uniform(kw, (out_features, in_features), jnp.float32, -k, k)
    b = jax.random.uniform(kb, (out_features,), jnp.float32, -k, k)
    return w, b


def init_fully_connected(key, input_size, hidden, out_size, num_layers):
    keys = jax.random.split(key, num_layers + 2)
    return {
        "first": init_linear(keys[0], input_size, hidden),
        "hidden": [init_linear(keys[1 + i], hidden, hidden)
                   for i in range(num_layers)],
        "out": init_linear(keys[num_layers + 1], hidden, out_size),
    }


# ---------------------------------------------------------------------------
# One-time packing: transpose to (in, out), zero-pad lane-dense, weights bf16.
# ---------------------------------------------------------------------------
def pack_params(params, input_size, hidden, out_size, num_layers):
    in_p = _round_up(input_size, _LANE)
    h_p = _round_up(hidden, _LANE)
    out_p = _round_up(out_size, _LANE)

    w0, b0 = params["first"]
    w0p = _pad_to(w0.T, (in_p, h_p)).astype(jnp.bfloat16)
    b0p = _pad_to(b0[None, :], (1, h_p))                 # bias stays f32

    wo, bo = params["out"]
    wop = _pad_to(wo.T, (h_p, out_p)).astype(jnp.bfloat16)
    bop = _pad_to(bo[None, :], (1, out_p))

    if num_layers > 0:
        whp = jnp.stack(
            [_pad_to(w.T, (h_p, h_p)) for w, _ in params["hidden"]]
        ).astype(jnp.bfloat16)
        bhp = jnp.stack(
            [_pad_to(b[None, :], (1, h_p)) for _, b in params["hidden"]])
        packed = (w0p, b0p, whp, bhp, wop, bop)
    else:
        # Do NOT create/pass dummy hidden weights when there are no layers.
        packed = (w0p, b0p, wop, bop)

    meta = dict(input_size=input_size, hidden=hidden, out_size=out_size,
                num_layers=num_layers, in_p=in_p, h_p=h_p, out_p=out_p)
    return packed, meta


# ---------------------------------------------------------------------------
# Forward: single fused pallas_call, whole wrapper under jax.jit.
# ---------------------------------------------------------------------------
def make_forward(meta):
    num_layers = meta["num_layers"]
    in_p, out_p = meta["in_p"], meta["out_p"]
    out_size = meta["out_size"]

    if num_layers > 0:
        kernel = functools.partial(_mlp_kernel_hidden, num_layers=num_layers)
    else:
        kernel = _mlp_kernel_no_hidden

    @jax.jit
    def forward(packed, x):
        batch = x.shape[0]
        b_p = _round_up(max(batch, _SUBLANE), _SUBLANE)
        x_p = _pad_to(x.astype(jnp.float32), (b_p, in_p)).astype(jnp.bfloat16)

        args = (x_p,) + tuple(packed)
        vmem = pl.BlockSpec(memory_space=pltpu.MemorySpace.VMEM)

        # Size the scoped VMEM limit from actual usage (2x for double-buffer).
        in_bytes = sum(int(a.size) * a.dtype.itemsize for a in args)
        out_bytes = b_p * out_p * 4
        vmem_limit = min(max((in_bytes + out_bytes) * 2 + (4 << 20), 32 << 20),
                         100 << 20)

        out_padded = pl.pallas_call(
            kernel,
            out_shape=jax.ShapeDtypeStruct((b_p, out_p), jnp.float32),
            in_specs=[vmem] * len(args),     # matches number of inputs
            out_specs=vmem,
            compiler_params=pltpu.CompilerParams(vmem_limit_bytes=vmem_limit),
        )(*args)

        # Slice padded rows/lanes away once, at the very end (fused by jit).
        return out_padded[:batch, :out_size]

    return forward


# ---------------------------------------------------------------------------
# Pure-JAX f32 reference (mirrors the PyTorch module exactly) for validation.
# ---------------------------------------------------------------------------
def reference_forward(params, x):
    w, b = params["first"]
    h = jnp.maximum(x @ w.T + b, 0.0)
    for w, b in params["hidden"]:
        h = jnp.maximum(h @ w.T + b, 0.0)
    h = jnp.maximum(h, 0.0)
    w, b = params["out"]
    return h @ w.T + b


if __name__ == "__main__":
    key = jax.random.PRNGKey(0)
    k_params, k_x = jax.random.split(key)

    batch, input_size, hidden, out_size, num_layers = 8, 16, 32, 4, 2
    params = init_fully_connected(k_params, input_size, hidden, out_size,
                                  num_layers)
    packed, meta = pack_params(params, input_size, hidden, out_size,
                               num_layers)
    forward = make_forward(meta)

    x = jax.random.normal(k_x, (batch, input_size), jnp.float32)

    y = jax.block_until_ready(forward(packed, x))
    assert y.shape == (batch, out_size)

    y_ref = jax.block_until_ready(reference_forward(params, x))
    max_err = float(jnp.max(jnp.abs(y - y_ref)))
    # bf16 weights/activations with f32 accumulation -> relaxed tolerance.
    assert max_err < 5e-2, f"max abs err {max_err}"

    print("KERNEL_OK")
</pallas_src>

<mosaic_0001>
module attributes {stable_mosaic.version = 11 : i64} {
  func.func @_mlp_kernel_hidden(%arg0: memref<16x128xbf16, #tpu.memory_space<vmem>>, %arg1: memref<128x128xbf16, #tpu.memory_space<vmem>>, %arg2: memref<1x128xf32, #tpu.memory_space<vmem>>, %arg3: memref<2x128x128xbf16, #tpu.memory_space<vmem>>, %arg4: memref<2x1x128xf32, #tpu.memory_space<vmem>>, %arg5: memref<128x128xbf16, #tpu.memory_space<vmem>>, %arg6: memref<1x128xf32, #tpu.memory_space<vmem>>, %arg7: memref<16x128xf32, #tpu.memory_space<vmem>>) attributes {dimension_semantics = [], scalar_prefetch = 0 : i64, scratch_operands = 0 : i64, tpu.core_type = #tpu.core_type<tc>} {
    %c0 = arith.constant 0 : index
    %c0_0 = arith.constant 0 : index
    %0 = vector.load %arg0[%c0, %c0_0] : memref<16x128xbf16, #tpu.memory_space<vmem>>, vector<16x128xbf16>
    %c0_1 = arith.constant 0 : index
    %c0_2 = arith.constant 0 : index
    %1 = vector.load %arg1[%c0_1, %c0_2] : memref<128x128xbf16, #tpu.memory_space<vmem>>, vector<128x128xbf16>
    %cst = arith.constant dense<0.000000e+00> : vector<16x128xf32>
    %2 = tpu.matmul %0, %1, %cst {dimension_numbers = #tpu.dot_dimension_numbers<[1], [0], [0], [1], [0, 0, 1, 1], [], []>} : vector<16x128xbf16>, vector<128x128xbf16>, vector<16x128xf32> -> vector<16x128xf32>
    %c0_3 = arith.constant 0 : index
    %c0_4 = arith.constant 0 : index
    %3 = vector.load %arg2[%c0_3, %c0_4] : memref<1x128xf32, #tpu.memory_space<vmem>>, vector<1x128xf32>
    %4 = vector.broadcast %3 : vector<1x128xf32> to vector<16x128xf32>
    %5 = arith.addf %2, %4 : vector<16x128xf32>
    %cst_5 = arith.constant 0.000000e+00 : f32
    %6 = vector.broadcast %cst_5 : f32 to vector<16x128xf32>
    %7 = arith.maximumf %5, %6 : vector<16x128xf32>
    %8 = arith.truncf %7 : vector<16x128xf32> to vector<16x128xbf16>
    %c0_6 = arith.constant 0 : index
    %c0_7 = arith.constant 0 : index
    %c0_8 = arith.constant 0 : index
    %9 = vector.load %arg3[%c0_6, %c0_7, %c0_8] : memref<2x128x128xbf16, #tpu.memory_space<vmem>>, vector<1x128x128xbf16>
    %10 = vector.shape_cast %9 : vector<1x128x128xbf16> to vector<128x128xbf16>
    %cst_9 = arith.constant dense<0.000000e+00> : vector<16x128xf32>
    %11 = tpu.matmul %8, %10, %cst_9 {dimension_numbers = #tpu.dot_dimension_numbers<[1], [0], [0], [1], [0, 0, 1, 1], [], []>} : vector<16x128xbf16>, vector<128x128xbf16>, vector<16x128xf32> -> vector<16x128xf32>
    %c0_10 = arith.constant 0 : index
    %c0_11 = arith.constant 0 : index
    %c0_12 = arith.constant 0 : index
    %12 = vector.load %arg4[%c0_10, %c0_11, %c0_12] : memref<2x1x128xf32, #tpu.memory_space<vmem>>, vector<1x1x128xf32>
    %13 = vector.shape_cast %12 : vector<1x1x128xf32> to vector<1x128xf32>
    %14 = vector.broadcast %13 : vector<1x128xf32> to vector<16x128xf32>
    %15 = arith.addf %11, %14 : vector<16x128xf32>
    %cst_13 = arith.constant 0.000000e+00 : f32
    %16 = vector.broadcast %cst_13 : f32 to vector<16x128xf32>
    %17 = arith.maximumf %15, %16 : vector<16x128xf32>
    %18 = arith.truncf %17 : vector<16x128xf32> to vector<16x128xbf16>
    %c1 = arith.constant 1 : index
    %c0_14 = arith.constant 0 : index
    %c0_15 = arith.constant 0 : index
    %19 = vector.load %arg3[%c1, %c0_14, %c0_15] : memref<2x128x128xbf16, #tpu.memory_space<vmem>>, vector<1x128x128xbf16>
    %20 = vector.shape_cast %19 : vector<1x128x128xbf16> to vector<128x128xbf16>
    %cst_16 = arith.constant dense<0.000000e+00> : vector<16x128xf32>
    %21 = tpu.matmul %18, %20, %cst_16 {dimension_numbers = #tpu.dot_dimension_numbers<[1], [0], [0], [1], [0, 0, 1, 1], [], []>} : vector<16x128xbf16>, vector<128x128xbf16>, vector<16x128xf32> -> vector<16x128xf32>
    %c1_17 = arith.constant 1 : index
    %c0_18 = arith.constant 0 : index
    %c0_19 = arith.constant 0 : index
    %22 = vector.load %arg4[%c1_17, %c0_18, %c0_19] : memref<2x1x128xf32, #tpu.memory_space<vmem>>, vector<1x1x128xf32>
    %23 = vector.shape_cast %22 : vector<1x1x128xf32> to vector<1x128xf32>
    %24 = vector.broadcast %23 : vector<1x128xf32> to vector<16x128xf32>
    %25 = arith.addf %21, %24 : vector<16x128xf32>
    %cst_20 = arith.constant 0.000000e+00 : f32
    %26 = vector.broadcast %cst_20 : f32 to vector<16x128xf32>
    %27 = arith.maximumf %25, %26 : vector<16x128xf32>
    %28 = arith.truncf %27 : vector<16x128xf32> to vector<16x128xbf16>
    %c0_21 = arith.constant 0 : index
    %c0_22 = arith.constant 0 : index
    %29 = vector.load %arg5[%c0_21, %c0_22] : memref<128x128xbf16, #tpu.memory_space<vmem>>, vector<128x128xbf16>
    %cst_23 = arith.constant dense<0.000000e+00> : vector<16x128xf32>
    %30 = tpu.matmul %28, %29, %cst_23 {dimension_numbers = #tpu.dot_dimension_numbers<[1], [0], [0], [1], [0, 0, 1, 1], [], []>} : vector<16x128xbf16>, vector<128x128xbf16>, vector<16x128xf32> -> vector<16x128xf32>
    %c0_24 = arith.constant 0 : index
    %c0_25 = arith.constant 0 : index
    %31 = vector.load %arg6[%c0_24, %c0_25] : memref<1x128xf32, #tpu.memory_space<vmem>>, vector<1x128xf32>
    %32 = vector.broadcast %31 : vector<1x128xf32> to vector<16x128xf32>
    %33 = arith.addf %30, %32 : vector<16x128xf32>
    %c0_26 = arith.constant 0 : index
    %c0_27 = arith.constant 0 : index
    %34 = vector.load %arg7[%c0_26, %c0_27] : memref<16x128xf32, #tpu.memory_space<vmem>>, vector<16x128xf32>
    tpu.vector_store %arg7[%c0_26, %c0_27], %33 {strides = array<i32>} : memref<16x128xf32, #tpu.memory_space<vmem>>, vector<16x128xf32>,
    return
  }
}

</mosaic_0001>

<bundles_post_ra>
// kernel: forward.1
= control target key start
LH: loop header
LB: loop body
LE: loop exit
PB: predicated region body
PF: predicated region fallthrough
CT: control target
= control target key end

     0   :  { %12 = vsyncpa [#allocation3], 0  ;;  %s754_s0 = inlined_call_operand.vmem [shape: bf16[16,128], index: 0, kind: input, shape index: {}]   ;;  %s755_s1 = inlined_call_operand.hbm [shape: bf16[128,128], index: 1, kind: input, shape index: {}]   ;;  %s756_s2 = inlined_call_operand.vmem [shape: f32[1,128], index: 2, kind: input, shape index: {}]   ;;  %s757_s3 = inlined_call_operand.hbm [shape: bf16[2,128,128], index: 3, kind: input, shape index: {}]   ;;  %s758_s4 = inlined_call_operand.vmem [shape: f32[2,1,128], index: 4, kind: input, shape index: {}]   ;;  %s759_s5 = inlined_call_operand.hbm [shape: bf16[128,128], index: 5, kind: input, shape index: {}]   ;;  %s760_s6 = inlined_call_operand.vmem [shape: f32[1,128], index: 6, kind: input, shape index: {}]   ;;  %s761_s7 = inlined_call_operand.vmem [shape: f32[16,128], index: 7, kind: output, shape index: {}]  }
   0x1   :  { %13 = vsyncpa [#allocation5], 0  ;;  %s35_s26 = sshll.u32 %s757_s3, 4  ;;  %s679_s27 = smov [#allocation4]   ;;  %s36_s26 = int_to_ptr.hbm [resolvable:$true] %s35_s26 }
   0x2   :  { %s37_s28 = sshll.u32 %s679_s27, 4  ;;  %s20_s8 = sshll.u32 %s755_s1, 4  ;;  %s38_s28 = int_to_ptr.vmem [resolvable:$true] %s37_s28  ;;  %s21_s8 = int_to_ptr.hbm [resolvable:$true] %s20_s8 }
   0x3   :  { %s680_s9 = smov 64   ;;  %s681_s10 = smov 4  }
   0x4   :  { %43 = dma.hbm_to_vmem [thread:$0]  %s36_s26, 2048, %s38_s28, [#allocation5], %s680_s9, %s680_s9, %s681_s10  }
   0x5   :  { %s682_s11 = smov [#allocation2]   ;;  %s50_s15 = sshll.u32 %s759_s5, 4  ;;  %s51_s15 = int_to_ptr.hbm [resolvable:$true] %s50_s15 }
   0x6   :  { %s22_s12 = sshll.u32 %s682_s11, 4  ;;  %s683_s3 = smov [#allocation6]   ;;  %s23_s12 = int_to_ptr.vmem [resolvable:$true] %s22_s12 }
   0x7   :  { %28 = dma.hbm_to_vmem [thread:$0]  %s21_s8, 1024, %s23_s12, [#allocation3], %s680_s9, %s680_s9, %s681_s10  }
   0x8   :  { %s52_s16 = sshll.u32 %s683_s3, 4  ;;  %s53_s16 = int_to_ptr.vmem [resolvable:$true] %s52_s16 }
   0x9   :  { %58 = dma.hbm_to_vmem [thread:$0]  %s51_s15, 1024, %s53_s16, [#allocation5], %s680_s9, %s680_s9, %s681_s10  }
   0xa   :  { %675 = dma.done.wait [#allocation3], 1024  }
   0xb   :  { %676 = vsyncadd [#allocation3], 4294966272 }
   0xc   :  { %677 = dma.done.wait [#allocation5], 3072  }
   0xd   :  { %678 = vsyncadd [#allocation5], 4294964224  ;;  %v569_v0 = vld [vmem:[#allocation2 + $0x38] sm:$0xff]  ;;  %v568_v1 = vld [vmem:[#allocation2 + $0x30] sm:$0xff] }
   0xe   :  { %149 = vmatpush.bf16.msra.mxu0 %v569_v0  ;;  %v577_v2 = vld [vmem:[#allocation4 + $0x38] sm:$0xff]  ;;  %v576_v3 = vld [vmem:[#allocation4 + $0x30] sm:$0xff]  ;;  %v567_v4 = vld [vmem:[#allocation2 + $0x28] sm:$0xff] }
   0xf   :  { %234 = vmatpush.bf16.msra.mxu1 %v577_v2  ;;  %v575_v5 = vld [vmem:[#allocation4 + $0x28] sm:$0xff]  ;;  %v566_v6 = vld [vmem:[#allocation2 + $0x20] sm:$0xff]  ;;  %v565_v8 = vld [vmem:[#allocation2 + $0x18] sm:$0xff] }
  0x10   :  { %v574_v7 = vld [vmem:[#allocation4 + $0x20] sm:$0xff]  ;;  %v564_v9 = vld [vmem:[#allocation2 + $0x10] sm:$0xff]  ;;  %v563_v10 = vld [vmem:[#allocation2 + $0x8] sm:$0xff] }
  0x11   :  { %v562_v11 = vld [vmem:[#allocation2] sm:$0xff]  ;;  %v573_v13 = vld [vmem:[#allocation4 + $0x18] sm:$0xff]  ;;  %v572_v14 = vld [vmem:[#allocation4 + $0x10] sm:$0xff] }
  0x12   :  { %150 = vmatpush.bf16.msra.mxu0 %v568_v1  ;;  %v561_v12 = vld [vmem:[%s754_s0] sm:$0xff]  ;;  %v571_v15 = vld [vmem:[#allocation4 + $0x8] sm:$0xff]  ;;  %v585_v17 = vld [vmem:[#allocation4 + $0x78] sm:$0xff] }
  0x13   :  { %235 = vmatpush.bf16.msra.mxu1 %v576_v3  ;;  %v570_v16 = vld [vmem:[#allocation4] sm:$0xff]  ;;  %321 = vmatpush.bf16.msra.mxu2 %v585_v17  ;;  %v584_v18 = vld [vmem:[#allocation4 + $0x70] sm:$0xff]  ;;  %v583_v19 = vld [vmem:[#allocation4 + $0x68] sm:$0xff] }
  0x14   :  { %v582_v20 = vld [vmem:[#allocation4 + $0x60] sm:$0xff]  ;;  %v581_v29 = vld [vmem:[#allocation4 + $0x58] sm:$0xff]  ;;  %v580_v30 = vld [vmem:[#allocation4 + $0x50] sm:$0xff] }
  0x15   :  { %v599_v22 = vld [vmem:[%s756_s2] ss:$0 sm:$0xff]  ;;  %v579_v31 = vld [vmem:[#allocation4 + $0x48] sm:$0xff]  ;;  %v593_v33 = vld [vmem:[#allocation6 + $0x38] sm:$0xff] }
  0x16   :  { %151 = vmatpush.bf16.msra.mxu0 %v567_v4  ;;  %v578_v32 = vld [vmem:[#allocation4 + $0x40] sm:$0xff]  ;;  %406 = vmatpush.bf16.msra.mxu3 %v593_v33  ;;  %v592_v34 = vld [vmem:[#allocation6 + $0x30] sm:$0xff]  ;;  %v591_v35 = vld [vmem:[#allocation6 + $0x28] sm:$0xff] }
  0x17   :  { %236 = vmatpush.bf16.msra.mxu1 %v575_v5  ;;  %322 = vmatpush.bf16.msra.mxu2 %v584_v18  ;;  %v590_v36 = vld [vmem:[#allocation6 + $0x20] sm:$0xff]  ;;  %v589_v45 = vld [vmem:[#allocation6 + $0x18] sm:$0xff]  ;;  %v588_v46 = vld [vmem:[#allocation6 + $0x10] sm:$0xff] }
  0x18   :  { %v600_v38 = vld [vmem:[%s758_s4] ss:$0 sm:$0xff]  ;;  %v587_v47 = vld [vmem:[#allocation6 + $0x8] sm:$0xff]  ;;  %v601_v50 = vld [vmem:[%s758_s4 + $0x1] ss:$0 sm:$0xff] }
  0x19   :  { %v586_v48 = vld [vmem:[#allocation6] sm:$0xff] }
  0x1a   :  { %152 = vmatpush.bf16.msra.mxu0 %v566_v6  ;;  %407 = vmatpush.bf16.msra.mxu3 %v592_v34  ;;  %v602_v57 = vld [vmem:[%s760_s6] ss:$0 sm:$0xff] }
  0x1b   :  { %237 = vmatpush.bf16.msra.mxu1 %v574_v7  ;;  %323 = vmatpush.bf16.msra.mxu2 %v583_v19 }
  0x1e   :  { %153 = vmatpush.bf16.msra.mxu0 %v565_v8  ;;  %408 = vmatpush.bf16.msra.mxu3 %v591_v35 }
  0x1f   :  { %238 = vmatpush.bf16.msra.mxu1 %v573_v13  ;;  %324 = vmatpush.bf16.msra.mxu2 %v582_v20 }
  0x22   :  { %154 = vmatpush.bf16.msra.mxu0 %v564_v9  ;;  %409 = vmatpush.bf16.msra.mxu3 %v590_v36 }
  0x23   :  { %239 = vmatpush.bf16.msra.mxu1 %v572_v14  ;;  %325 = vmatpush.bf16.msra.mxu2 %v581_v29 }
  0x26   :  { %155 = vmatpush.bf16.msra.mxu0 %v563_v10  ;;  %410 = vmatpush.bf16.msra.mxu3 %v589_v45 }
  0x27   :  { %240 = vmatpush.bf16.msra.mxu1 %v571_v15  ;;  %326 = vmatpush.bf16.msra.mxu2 %v580_v30 }
  0x2a   :  { %156 = vmatpush.bf16.msra.mxu0 %v562_v11  ;;  %411 = vmatpush.bf16.msra.mxu3 %v588_v46 }
  0x2b   :  { %241 = vmatpush.bf16.msra.mxu1 %v570_v16  ;;  %327 = vmatpush.bf16.msra.mxu2 %v579_v31 }
  0x2d   :  { %157 = vmatmul.bf16.vlgmr.msra.gmra.mxu0 %v561_v12 }
  0x2e   :  { %412 = vmatpush.bf16.msra.mxu3 %v587_v47 }
  0x2f   :  { %328 = vmatpush.bf16.msra.mxu2 %v578_v32 }
  0x32   :  { %413 = vmatpush.bf16.msra.mxu3 %v586_v48 }
  0xaa   :  { %v158_v21 = vpop.f32.mrf.mxu0 }
  0xab   :  { %v159_v23 = vadd.f32 %v599_v22, %v158_v21 }
  0xad   :  { %v163_v26 = vmax.f32 %v159_v23, 0.0 }
  0xb2   :  { %v160_v24 = vpop.f32.mrf.mxu0 }
  0xb3   :  { %v161_v25 = vadd.f32 %v599_v22, %v160_v24 }
  0xb5   :  { %v164_v27 = vmax.f32 %v161_v25, 0.0 }
  0xb7   :  { %v165_v28 = vpack.c.bf16 %v164_v27, %v163_v26 }
  0xb9   :  { %242 = vmatmul.bf16.vlgmr.msra.gmra.mxu1 %v165_v28 }
 0x136   :  { %v243_v37 = vpop.f32.mrf.mxu1 }
 0x137   :  { %v244_v39 = vadd.f32 %v600_v38, %v243_v37 }
 0x139   :  { %v248_v42 = vmax.f32 %v244_v39, 0.0 }
 0x13e   :  { %v245_v40 = vpop.f32.mrf.mxu1 }
 0x13f   :  { %v246_v41 = vadd.f32 %v600_v38, %v245_v40 }
 0x141   :  { %v249_v43 = vmax.f32 %v246_v41, 0.0 }
 0x143   :  { %v250_v44 = vpack.c.bf16 %v249_v43, %v248_v42 }
 0x145   :  { %329 = vmatmul.bf16.vlgmr.msra.gmra.mxu2 %v250_v44 }
 0x1c8   :  { %v330_v49 = vpop.f32.mrf.mxu2 }
 0x1c9   :  { %v331_v51 = vadd.f32 %v601_v50, %v330_v49 }
 0x1cb   :  { %v335_v54 = vmax.f32 %v331_v51, 0.0 }
 0x1d0   :  { %v332_v52 = vpop.f32.mrf.mxu2 }
 0x1d1   :  { %v333_v53 = vadd.f32 %v601_v50, %v332_v52 }
 0x1d3   :  { %v336_v55 = vmax.f32 %v333_v53, 0.0 }
 0x1d5   :  { %v337_v56 = vpack.c.bf16 %v336_v55, %v335_v54 }
 0x1d7   :  { %414 = vmatmul.bf16.vlgmr.msra.gmra.mxu3 %v337_v56 }
 0x25a   :  { %v415_v58 = vpop.f32.mrf.mxu3 }
 0x25b   :  { %v416_v59 = vadd.f32 %v602_v57, %v415_v58 }
 0x25d   :  { %420 = vst [vmem:[%s761_s7] sm:$0xff] %v416_v59 }
 0x262   :  { %v417_v60 = vpop.f32.mrf.mxu3 }
 0x263   :  { %v418_v61 = vadd.f32 %v602_v57, %v417_v60 }
 0x265   :  { %421 = vst [vmem:[%s761_s7 + $0x8] sm:$0xff] %v418_v61 }
 0x266   :  { %426 = vsyncpa [#allocation3], 1 }
 0x267   :  { %427 = vsyncpa [#allocation5], 1 }

</bundles_post_ra>
